<compile_context>
chip_gen: v7x
topology: tpu7x:2x2x1
jax: 0.10.0
libtpu: 0.0.40
codegen_flags: <defaults>
</compile_context>

<pallas_src>
import functools

import numpy as np
import jax
import jax.numpy as jnp
from jax.experimental import pallas as pl
from jax.experimental.pallas import tpu as pltpu

LANE = 128
BF16_SUBLANE = 16  # bf16 packs 16 rows per vreg


def _round_up(x, m):
    return ((x + m - 1) // m) * m


def _mlp_kernel(x_ref, w1_ref, wrest_ref, b_ref, out_ref, *, num_layers):
    """Fused MLP forward for one batch tile.

    x_ref:     (TILE_B, IN)        bf16  -- unpadded input activations
    w1_ref:    (IN, PAD)           bf16  -- first-layer weight (K = in_features), resident
    wrest_ref: (L-1, PAD, PAD)     bf16  -- remaining weights, resident in VMEM
    b_ref:     (L, 1, PAD)         bf16  -- biases, resident
    out_ref:   (TILE_B, PAD)       bf16  -- lane-dense padded output slab
    """
    # Layer 0: bf16 matmul -> f32 acc, bias add + ReLU in f32, carry bf16.
    acc = jnp.dot(x_ref[...], w1_ref[...], preferred_element_type=jnp.float32)
    acc += b_ref[0].astype(jnp.float32)
    h = jnp.maximum(acc, 0.0).astype(jnp.bfloat16)

    # Hidden layers 1 .. L-2.
    for l in range(1, num_layers - 1):
        acc = jnp.dot(h, wrest_ref[l - 1], preferred_element_type=jnp.float32)
        acc += b_ref[l].astype(jnp.float32)
        h = jnp.maximum(acc, 0.0).astype(jnp.bfloat16)

    # Final Linear, no activation; bf16 writeback halves the output DMA.
    acc = jnp.dot(h, wrest_ref[num_layers - 2], preferred_element_type=jnp.float32)
    acc += b_ref[num_layers - 1].astype(jnp.float32)
    out_ref[...] = acc.astype(out_ref.dtype)


def pack_params(params, pad):
    """Pack weights/biases: separate first-layer weight (K=in_features), the rest in one slab."""
    num_layers = len(params)
    assert num_layers >= 2
    in_features, first_out = params[0][0].shape
    assert first_out <= pad
    for w, _ in params[1:]:
        assert w.shape[0] <= pad and w.shape[1] <= pad

    w1 = np.zeros((in_features, pad), np.float32)
    w1[:, :first_out] = np.asarray(params[0][0])

    w_rest = np.zeros((num_layers - 1, pad, pad), np.float32)
    b_all = np.zeros((num_layers, 1, pad), np.float32)
    b_all[0, 0, :first_out] = np.asarray(params[0][1]).reshape(-1)
    for l in range(1, num_layers):
        w, b = params[l]
        fi, fo = w.shape
        w_rest[l - 1, :fi, :fo] = np.asarray(w)
        b_all[l, 0, :fo] = np.asarray(b).reshape(-1)

    return (jnp.asarray(w1, jnp.bfloat16),
            jnp.asarray(w_rest, jnp.bfloat16),
            jnp.asarray(b_all, jnp.bfloat16))


def neural_net_v0_forward(x, params, *, tile_b_max=1024):
    """params: list of 7 (W, b) pairs, W shape (in, out), b shape (1, out)."""
    num_layers = len(params)
    batch, in_features = x.shape
    out_features = params[-1][0].shape[1]

    # Lane-dense padded width for hidden/output dims. Do NOT widen past 128: real widths
    # are <= 32, so wider tiles would only add zero FLOPs and weight-DMA bytes.
    pad = _round_up(max(w.shape[1] for w, _ in params), LANE)

    # Batch tiling: round to bf16 sublane packing (16). Keep at least 2 grid steps when the
    # batch permits so the "parallel" axis can shard tiles across both TensorCores (v7x).
    rounded = _round_up(batch, BF16_SUBLANE)
    tile_b = min(rounded, tile_b_max)
    if tile_b == rounded and rounded >= 2 * BF16_SUBLANE:
        tile_b = _round_up((rounded + 1) // 2, BF16_SUBLANE)
    batch_pad = _round_up(batch, tile_b)
    grid = (batch_pad // tile_b,)

    w1, w_rest, b_all = pack_params(params, pad)

    # Single bf16 cast; pad only the batch rows (feature dim stays unpadded).
    x_in = x.astype(jnp.bfloat16)
    if batch_pad != batch:
        x_in = jnp.zeros((batch_pad, in_features), jnp.bfloat16).at[:batch].set(x_in)

    flops = 2 * batch_pad * (in_features * pad + (num_layers - 1) * pad * pad)
    bytes_accessed = 2 * (x_in.size + w1.size + w_rest.size + b_all.size + batch_pad * pad)
    cost = pl.CostEstimate(flops=flops, transcendentals=0, bytes_accessed=bytes_accessed)

    out_pad = pl.pallas_call(
        functools.partial(_mlp_kernel, num_layers=num_layers),
        out_shape=jax.ShapeDtypeStruct((batch_pad, pad), jnp.bfloat16),
        grid_spec=pltpu.PrefetchScalarGridSpec(
            num_scalar_prefetch=0,
            grid=grid,
            in_specs=[
                pl.BlockSpec((tile_b, in_features), lambda i: (i, 0)),           # activations
                pl.BlockSpec((in_features, pad), lambda i: (0, 0)),              # W1 (resident)
                pl.BlockSpec((num_layers - 1, pad, pad), lambda i: (0, 0, 0)),   # W2..WL (resident)
                pl.BlockSpec((num_layers, 1, pad), lambda i: (0, 0, 0)),         # biases (resident)
            ],
            out_specs=pl.BlockSpec((tile_b, pad), lambda i: (i, 0)),
        ),
        compiler_params=pltpu.CompilerParams(
            dimension_semantics=("parallel",),          # shard batch tiles across TCs (v7x)
            vmem_limit_bytes=32 * 1024 * 1024,          # safe on v5e/v6e/v7x; usage ~1 MiB
        ),
        cost_estimate=cost,
    )(x_in, w1, w_rest, b_all)

    return out_pad[:batch, :out_features].astype(jnp.float32)


def init_params(key, input_features, hidden_units, output_features):
    """Deterministic init mimicking PyTorch Linear default: U(-1/sqrt(fan_in), +1/sqrt(fan_in))."""
    dims = [input_features] + [hidden_units] * 6 + [output_features]
    params = []
    for i in range(7):
        fan_in, fan_out = dims[i], dims[i + 1]
        key, kw, kb = jax.random.split(key, 3)
        bound = 1.0 / (fan_in ** 0.5)
        w = jax.random.uniform(kw, (fan_in, fan_out), jnp.float32, -bound, bound)
        b = jax.random.uniform(kb, (1, fan_out), jnp.float32, -bound, bound)
        params.append((w, b))
    return params


def reference_forward(x, params):
    """Pure-JAX reference mirroring the kernel numerics:
    bf16 matmul operands, f32 accumulation + bias + ReLU, bf16 carried activations/output.
    (Note: results differ from an f32 PyTorch NeuralNetV0 at ~bf16 precision by design.)
    """
    h = x.astype(jnp.bfloat16)
    n = len(params)
    out = None
    for i, (w, b) in enumerate(params):
        acc = jnp.dot(h, w.astype(jnp.bfloat16), preferred_element_type=jnp.float32)
        acc = acc + b.astype(jnp.bfloat16).astype(jnp.float32)
        if i < n - 1:
            h = jnp.maximum(acc, 0.0).astype(jnp.bfloat16)
        else:
            out = acc
    return out.astype(jnp.bfloat16).astype(jnp.float32)


if __name__ == "__main__":
    # TODO(synk): only the forward pass is implemented; fit/predict/show_results (training
    # loop, pandas/sklearn plumbing) have no Pallas equivalent.
    key = jax.random.PRNGKey(0)
    k_x, k_p = jax.random.split(key)

    batch = 8
    input_features = 16
    hidden_units = 32
    output_features = 1

    x = jax.random.normal(k_x, (batch, input_features), jnp.float32)
    params = init_params(k_p, input_features, hidden_units, output_features)

    out = neural_net_v0_forward(x, params)
    out = jax.block_until_ready(out)

    ref = reference_forward(x, params)
    assert out.shape == (batch, output_features), out.shape
    assert jnp.allclose(out, ref, atol=1e-2, rtol=1e-2), "mismatch vs reference"

    print("KERNEL_OK")
</pallas_src>

<mosaic_0001>
module attributes {stable_mosaic.version = 11 : i64} {
  func.func @_mlp_kernel(%arg0: i32, %arg1: memref<16x16xbf16, #tpu.memory_space<vmem>>, %arg2: memref<16x128xbf16, #tpu.memory_space<vmem>>, %arg3: memref<6x128x128xbf16, #tpu.memory_space<vmem>>, %arg4: memref<7x1x128xbf16, #tpu.memory_space<vmem>>, %arg5: memref<16x128xbf16, #tpu.memory_space<vmem>>) attributes {dimension_semantics = [#tpu.dimension_semantics<parallel>], iteration_bounds = array<i64: 1>, scalar_prefetch = 0 : i64, scratch_operands = 0 : i64, tpu.core_type = #tpu.core_type<tc>, window_params = [{transform_indices = @transform_0, window_bounds = array<i64: 16, 16>}, {pipeline_mode = #tpu.pipeline_mode<synchronous>, transform_indices = @transform_1, window_bounds = array<i64: 16, 128>}, {pipeline_mode = #tpu.pipeline_mode<synchronous>, transform_indices = @transform_2, window_bounds = array<i64: 6, 128, 128>}, {pipeline_mode = #tpu.pipeline_mode<synchronous>, transform_indices = @transform_3, window_bounds = array<i64: 7, 1, 128>}, {transform_indices = @transform_4, window_bounds = array<i64: 16, 128>}]} {
    %c0 = arith.constant 0 : index
    %c0_0 = arith.constant 0 : index
    %0 = vector.load %arg1[%c0, %c0_0] : memref<16x16xbf16, #tpu.memory_space<vmem>>, vector<16x16xbf16>
    %c0_1 = arith.constant 0 : index
    %c0_2 = arith.constant 0 : index
    %1 = vector.load %arg2[%c0_1, %c0_2] : memref<16x128xbf16, #tpu.memory_space<vmem>>, vector<16x128xbf16>
    %cst = arith.constant dense<0.000000e+00> : vector<16x128xf32>
    %2 = tpu.matmul %0, %1, %cst {dimension_numbers = #tpu.dot_dimension_numbers<[1], [0], [0], [1], [0, 0, 1, 1], [], []>} : vector<16x16xbf16>, vector<16x128xbf16>, vector<16x128xf32> -> vector<16x128xf32>
    %c0_3 = arith.constant 0 : index
    %c0_4 = arith.constant 0 : index
    %c0_5 = arith.constant 0 : index
    %3 = vector.load %arg4[%c0_3, %c0_4, %c0_5] : memref<7x1x128xbf16, #tpu.memory_space<vmem>>, vector<1x1x128xbf16>
    %4 = vector.shape_cast %3 : vector<1x1x128xbf16> to vector<1x128xbf16>
    %5 = arith.extf %4 : vector<1x128xbf16> to vector<1x128xf32>
    %6 = vector.broadcast %5 : vector<1x128xf32> to vector<16x128xf32>
    %7 = arith.addf %2, %6 : vector<16x128xf32>
    %cst_6 = arith.constant 0.000000e+00 : f32
    %8 = vector.broadcast %cst_6 : f32 to vector<16x128xf32>
    %9 = arith.maximumf %7, %8 : vector<16x128xf32>
    %10 = arith.truncf %9 : vector<16x128xf32> to vector<16x128xbf16>
    %c0_7 = arith.constant 0 : index
    %c0_8 = arith.constant 0 : index
    %c0_9 = arith.constant 0 : index
    %11 = vector.load %arg3[%c0_7, %c0_8, %c0_9] : memref<6x128x128xbf16, #tpu.memory_space<vmem>>, vector<1x128x128xbf16>
    %12 = vector.shape_cast %11 : vector<1x128x128xbf16> to vector<128x128xbf16>
    %cst_10 = arith.constant dense<0.000000e+00> : vector<16x128xf32>
    %13 = tpu.matmul %10, %12, %cst_10 {dimension_numbers = #tpu.dot_dimension_numbers<[1], [0], [0], [1], [0, 0, 1, 1], [], []>} : vector<16x128xbf16>, vector<128x128xbf16>, vector<16x128xf32> -> vector<16x128xf32>
    %c1 = arith.constant 1 : index
    %c0_11 = arith.constant 0 : index
    %c0_12 = arith.constant 0 : index
    %14 = vector.load %arg4[%c1, %c0_11, %c0_12] : memref<7x1x128xbf16, #tpu.memory_space<vmem>>, vector<1x1x128xbf16>
    %15 = vector.shape_cast %14 : vector<1x1x128xbf16> to vector<1x128xbf16>
    %16 = arith.extf %15 : vector<1x128xbf16> to vector<1x128xf32>
    %17 = vector.broadcast %16 : vector<1x128xf32> to vector<16x128xf32>
    %18 = arith.addf %13, %17 : vector<16x128xf32>
    %cst_13 = arith.constant 0.000000e+00 : f32
    %19 = vector.broadcast %cst_13 : f32 to vector<16x128xf32>
    %20 = arith.maximumf %18, %19 : vector<16x128xf32>
    %21 = arith.truncf %20 : vector<16x128xf32> to vector<16x128xbf16>
    %c1_14 = arith.constant 1 : index
    %c0_15 = arith.constant 0 : index
    %c0_16 = arith.constant 0 : index
    %22 = vector.load %arg3[%c1_14, %c0_15, %c0_16] : memref<6x128x128xbf16, #tpu.memory_space<vmem>>, vector<1x128x128xbf16>
    %23 = vector.shape_cast %22 : vector<1x128x128xbf16> to vector<128x128xbf16>
    %cst_17 = arith.constant dense<0.000000e+00> : vector<16x128xf32>
    %24 = tpu.matmul %21, %23, %cst_17 {dimension_numbers = #tpu.dot_dimension_numbers<[1], [0], [0], [1], [0, 0, 1, 1], [], []>} : vector<16x128xbf16>, vector<128x128xbf16>, vector<16x128xf32> -> vector<16x128xf32>
    %c2 = arith.constant 2 : index
    %c0_18 = arith.constant 0 : index
    %c0_19 = arith.constant 0 : index
    %25 = vector.load %arg4[%c2, %c0_18, %c0_19] : memref<7x1x128xbf16, #tpu.memory_space<vmem>>, vector<1x1x128xbf16>
    %26 = vector.shape_cast %25 : vector<1x1x128xbf16> to vector<1x128xbf16>
    %27 = arith.extf %26 : vector<1x128xbf16> to vector<1x128xf32>
    %28 = vector.broadcast %27 : vector<1x128xf32> to vector<16x128xf32>
    %29 = arith.addf %24, %28 : vector<16x128xf32>
    %cst_20 = arith.constant 0.000000e+00 : f32
    %30 = vector.broadcast %cst_20 : f32 to vector<16x128xf32>
    %31 = arith.maximumf %29, %30 : vector<16x128xf32>
    %32 = arith.truncf %31 : vector<16x128xf32> to vector<16x128xbf16>
    %c2_21 = arith.constant 2 : index
    %c0_22 = arith.constant 0 : index
    %c0_23 = arith.constant 0 : index
    %33 = vector.load %arg3[%c2_21, %c0_22, %c0_23] : memref<6x128x128xbf16, #tpu.memory_space<vmem>>, vector<1x128x128xbf16>
    %34 = vector.shape_cast %33 : vector<1x128x128xbf16> to vector<128x128xbf16>
    %cst_24 = arith.constant dense<0.000000e+00> : vector<16x128xf32>
    %35 = tpu.matmul %32, %34, %cst_24 {dimension_numbers = #tpu.dot_dimension_numbers<[1], [0], [0], [1], [0, 0, 1, 1], [], []>} : vector<16x128xbf16>, vector<128x128xbf16>, vector<16x128xf32> -> vector<16x128xf32>
    %c3 = arith.constant 3 : index
    %c0_25 = arith.constant 0 : index
    %c0_26 = arith.constant 0 : index
    %36 = vector.load %arg4[%c3, %c0_25, %c0_26] : memref<7x1x128xbf16, #tpu.memory_space<vmem>>, vector<1x1x128xbf16>
    %37 = vector.shape_cast %36 : vector<1x1x128xbf16> to vector<1x128xbf16>
    %38 = arith.extf %37 : vector<1x128xbf16> to vector<1x128xf32>
    %39 = vector.broadcast %38 : vector<1x128xf32> to vector<16x128xf32>
    %40 = arith.addf %35, %39 : vector<16x128xf32>
    %cst_27 = arith.constant 0.000000e+00 : f32
    %41 = vector.broadcast %cst_27 : f32 to vector<16x128xf32>
    %42 = arith.maximumf %40, %41 : vector<16x128xf32>
    %43 = arith.truncf %42 : vector<16x128xf32> to vector<16x128xbf16>
    %c3_28 = arith.constant 3 : index
    %c0_29 = arith.constant 0 : index
    %c0_30 = arith.constant 0 : index
    %44 = vector.load %arg3[%c3_28, %c0_29, %c0_30] : memref<6x128x128xbf16, #tpu.memory_space<vmem>>, vector<1x128x128xbf16>
    %45 = vector.shape_cast %44 : vector<1x128x128xbf16> to vector<128x128xbf16>
    %cst_31 = arith.constant dense<0.000000e+00> : vector<16x128xf32>
    %46 = tpu.matmul %43, %45, %cst_31 {dimension_numbers = #tpu.dot_dimension_numbers<[1], [0], [0], [1], [0, 0, 1, 1], [], []>} : vector<16x128xbf16>, vector<128x128xbf16>, vector<16x128xf32> -> vector<16x128xf32>
    %c4 = arith.constant 4 : index
    %c0_32 = arith.constant 0 : index
    %c0_33 = arith.constant 0 : index
    %47 = vector.load %arg4[%c4, %c0_32, %c0_33] : memref<7x1x128xbf16, #tpu.memory_space<vmem>>, vector<1x1x128xbf16>
    %48 = vector.shape_cast %47 : vector<1x1x128xbf16> to vector<1x128xbf16>
    %49 = arith.extf %48 : vector<1x128xbf16> to vector<1x128xf32>
    %50 = vector.broadcast %49 : vector<1x128xf32> to vector<16x128xf32>
    %51 = arith.addf %46, %50 : vector<16x128xf32>
    %cst_34 = arith.constant 0.000000e+00 : f32
    %52 = vector.broadcast %cst_34 : f32 to vector<16x128xf32>
    %53 = arith.maximumf %51, %52 : vector<16x128xf32>
    %54 = arith.truncf %53 : vector<16x128xf32> to vector<16x128xbf16>
    %c4_35 = arith.constant 4 : index
    %c0_36 = arith.constant 0 : index
    %c0_37 = arith.constant 0 : index
    %55 = vector.load %arg3[%c4_35, %c0_36, %c0_37] : memref<6x128x128xbf16, #tpu.memory_space<vmem>>, vector<1x128x128xbf16>
    %56 = vector.shape_cast %55 : vector<1x128x128xbf16> to vector<128x128xbf16>
    %cst_38 = arith.constant dense<0.000000e+00> : vector<16x128xf32>
    %57 = tpu.matmul %54, %56, %cst_38 {dimension_numbers = #tpu.dot_dimension_numbers<[1], [0], [0], [1], [0, 0, 1, 1], [], []>} : vector<16x128xbf16>, vector<128x128xbf16>, vector<16x128xf32> -> vector<16x128xf32>
    %c5 = arith.constant 5 : index
    %c0_39 = arith.constant 0 : index
    %c0_40 = arith.constant 0 : index
    %58 = vector.load %arg4[%c5, %c0_39, %c0_40] : memref<7x1x128xbf16, #tpu.memory_space<vmem>>, vector<1x1x128xbf16>
    %59 = vector.shape_cast %58 : vector<1x1x128xbf16> to vector<1x128xbf16>
    %60 = arith.extf %59 : vector<1x128xbf16> to vector<1x128xf32>
    %61 = vector.broadcast %60 : vector<1x128xf32> to vector<16x128xf32>
    %62 = arith.addf %57, %61 : vector<16x128xf32>
    %cst_41 = arith.constant 0.000000e+00 : f32
    %63 = vector.broadcast %cst_41 : f32 to vector<16x128xf32>
    %64 = arith.maximumf %62, %63 : vector<16x128xf32>
    %65 = arith.truncf %64 : vector<16x128xf32> to vector<16x128xbf16>
    %c5_42 = arith.constant 5 : index
    %c0_43 = arith.constant 0 : index
    %c0_44 = arith.constant 0 : index
    %66 = vector.load %arg3[%c5_42, %c0_43, %c0_44] : memref<6x128x128xbf16, #tpu.memory_space<vmem>>, vector<1x128x128xbf16>
    %67 = vector.shape_cast %66 : vector<1x128x128xbf16> to vector<128x128xbf16>
    %cst_45 = arith.constant dense<0.000000e+00> : vector<16x128xf32>
    %68 = tpu.matmul %65, %67, %cst_45 {dimension_numbers = #tpu.dot_dimension_numbers<[1], [0], [0], [1], [0, 0, 1, 1], [], []>} : vector<16x128xbf16>, vector<128x128xbf16>, vector<16x128xf32> -> vector<16x128xf32>
    %c6 = arith.constant 6 : index
    %c0_46 = arith.constant 0 : index
    %c0_47 = arith.constant 0 : index
    %69 = vector.load %arg4[%c6, %c0_46, %c0_47] : memref<7x1x128xbf16, #tpu.memory_space<vmem>>, vector<1x1x128xbf16>
    %70 = vector.shape_cast %69 : vector<1x1x128xbf16> to vector<1x128xbf16>
    %71 = arith.extf %70 : vector<1x128xbf16> to vector<1x128xf32>
    %72 = vector.broadcast %71 : vector<1x128xf32> to vector<16x128xf32>
    %73 = arith.addf %68, %72 : vector<16x128xf32>
    %74 = arith.truncf %73 : vector<16x128xf32> to vector<16x128xbf16>
    %c0_48 = arith.constant 0 : index
    %c0_49 = arith.constant 0 : index
    %75 = vector.load %arg5[%c0_48, %c0_49] : memref<16x128xbf16, #tpu.memory_space<vmem>>, vector<16x128xbf16>
    tpu.vector_store %arg5[%c0_48, %c0_49], %74 {strides = array<i32>} : memref<16x128xbf16, #tpu.memory_space<vmem>>, vector<16x128xbf16>,
    return
  }
  func.func @transform_0(%arg0: i32) -> (i32, i32) {
    %c0_i32 = arith.constant 0 : i32
    %c0_i32_0 = arith.constant 0 : i32
    return %arg0, %c0_i32 : i32, i32
  }
  func.func @transform_1(%arg0: i32) -> (i32, i32) {
    %c0_i32 = arith.constant 0 : i32
    %c0_i32_0 = arith.constant 0 : i32
    %c0_i32_1 = arith.constant 0 : i32
    return %c0_i32, %c0_i32_0 : i32, i32
  }
  func.func @transform_2(%arg0: i32) -> (i32, i32, i32) {
    %c0_i32 = arith.constant 0 : i32
    %c0_i32_0 = arith.constant 0 : i32
    %c0_i32_1 = arith.constant 0 : i32
    %c0_i32_2 = arith.constant 0 : i32
    return %c0_i32, %c0_i32_0, %c0_i32_1 : i32, i32, i32
  }
  func.func @transform_3(%arg0: i32) -> (i32, i32, i32) {
    %c0_i32 = arith.constant 0 : i32
    %c0_i32_0 = arith.constant 0 : i32
    %c0_i32_1 = arith.constant 0 : i32
    %c0_i32_2 = arith.constant 0 : i32
    return %c0_i32, %c0_i32_0, %c0_i32_1 : i32, i32, i32
  }
  func.func @transform_4(%arg0: i32) -> (i32, i32) {
    %c0_i32 = arith.constant 0 : i32
    %c0_i32_0 = arith.constant 0 : i32
    return %arg0, %c0_i32 : i32, i32
  }
}

</mosaic_0001>

<bundles_post_ra>
// kernel: tpu_custom_call.1
= control target key start
LH: loop header
LB: loop body
LE: loop exit
PB: predicated region body
PF: predicated region fallthrough
CT: control target
= control target key end

     0   :  { %9 = vsyncpa [#allocation3], 0  ;;  %s1386_s0 = inlined_call_operand.vmem [shape: bf16[16,16], index: 0, kind: input, shape index: {}]   ;;  %s1387_s1 = inlined_call_operand.hbm [shape: bf16[16,128], index: 1, kind: input, shape index: {}]   ;;  %s1388_s2 = inlined_call_operand.hbm [shape: bf16[6,128,128], index: 2, kind: input, shape index: {}]   ;;  %s1389_s3 = inlined_call_operand.vmem [shape: bf16[7,1,128], index: 3, kind: input, shape index: {}]   ;;  %s1390_s4 = inlined_call_operand.hbm [shape: bf16[16,128], index: 4, kind: output, shape index: {}]  }
   0x1   :  { %10 = vsyncpa [#allocation6], 0 }
   0x2   :  { %11 = vsyncpa [#allocation4], 0  ;;  %s1213_s15 = smov [#allocation2]   ;;  %s1141_s19 = scalar_lea.hbm %s1387_s1, 128 }
   0x3   :  { %s19_s16 = sshll.u32 %s1213_s15, 4  ;;  %p1142_p0 = scmp.ne.s32.totalorder %s1387_s1, %s1141_s19  ;;  %s20_s16 = int_to_ptr.vmem [resolvable:$true] %s19_s16 }
   0x4   :  { %p1145_p1 = scmp.lt.u32.totalorder %s1141_s19, %s1387_s1 }
   0x6   :  { %p1147_p2 = pnand %p1145_p1, %p1142_p0 }
   0x8   :  { %1150 = shalt.err (!%p1147_p2)
}
   0x9   :  { %s1151_s24 = scalar_lea.vmem %s20_s16, 128  ;;  %p1156_p4 = scmp.lt.s32.totalorder %s20_s16, %s20_s16 }
   0xa   :  { %p1152_p3 = scmp.ne.s32.totalorder %s20_s16, %s1151_s24  ;;  %p1157_p5 = scmp.lt.s32.totalorder %s1151_s24, %s1151_s24 }
   0xc   :  { %p1158_p6 = por %p1157_p5, %p1156_p4 }
   0xe   :  { %p1159_p7 = pnand %p1158_p6, %p1152_p3 }
  0x10   :  { %1162 = shalt.err (!%p1159_p7)
}
  0x11   :  { %s1214_s25 = smov 64   ;;  %s1215_s26 = smov 4  }
  0x12   :  { %25 = dma.hbm_to_vmem [thread:$0]  %s1387_s1, 128, %s20_s16, [#allocation3], %s1214_s25, %s1214_s25, %s1215_s26  }
  0x13   :  { %s1216_s29 = smov [#allocation5]   ;;  %s1163_s7 = scalar_lea.hbm %s1388_s2, 6144 }
  0x14   :  { %s31_s30 = sshll.u32 %s1216_s29, 4  ;;  %p1164_p8 = scmp.ne.s32.totalorder %s1388_s2, %s1163_s7  ;;  %s32_s30 = int_to_ptr.vmem [resolvable:$true] %s31_s30 }
  0x15   :  { %p1167_p9 = scmp.lt.u32.totalorder %s1163_s7, %s1388_s2 }
  0x17   :  { %p1169_p10 = pnand %p1167_p9, %p1164_p8 }
  0x19   :  { %1172 = shalt.err (!%p1169_p10)
}
  0x1a   :  { %s1173_s12 = scalar_lea.vmem %s32_s30, 6144  ;;  %p1178_p12 = scmp.lt.s32.totalorder %s32_s30, %s32_s30 }
  0x1b   :  { %p1174_p11 = scmp.ne.s32.totalorder %s32_s30, %s1173_s12  ;;  %p1179_p13 = scmp.lt.s32.totalorder %s1173_s12, %s1173_s12 }
  0x1d   :  { %p1180_p0 = por %p1179_p13, %p1178_p12 }
  0x1f   :  { %p1181_p1 = pnand %p1180_p0, %p1174_p11 }
  0x21   :  { %1184 = shalt.err (!%p1181_p1)
}
  0x22   :  { %37 = dma.hbm_to_vmem [thread:$0]  %s1388_s2, 6144, %s32_s30, [#allocation6], %s1214_s25, %s1214_s25, %s1215_s26  }
  0x23   :  { %1207 = dma.done.wait [#allocation3], 128  }
  0x24   :  { %1208 = vsyncadd [#allocation3], 4294967168 }
  0x25   :  { %1209 = dma.done.wait [#allocation6], 6144  }
  0x26   :  { %1210 = vsyncadd [#allocation6], 4294961152  ;;  %v1217_v0 = vmov 0.0   ;;  %vm1218_vm0 = vmmov 0   ;;  %v1091_v1 = vld [vmem:[#allocation2] sm:$0xff]   ;;  %vm68_vm1 = vcmask 130048   ;;  %v53_v17 = vlaneseq }
  0x27   :  { %958 = vmatprep.subr.bf16.mxu0 %v1217_v0  ;;  %960 = vmatprep.mubr.msk.bf16.mxu0 %vm1218_vm0, %v1217_v0  ;;  %v1092_v2 = vld [vmem:[%s1386_s0] sm:$0xff]   ;;  %v1093_v3 = vld [vmem:[#allocation5] sm:$0xff]   ;;  %v1094_v4 = vld [vmem:[#allocation5 + $0x8] sm:$0xff]   ;;  %s1219_s30 = smov [#allocation7]  }
  0x28   :  { %964 = vmatprep.subr.bf16.mxu1 %v1217_v0  ;;  %980 = vmatprep.mubr.msk.bf16.mxu1 %vm1218_vm0, %v1217_v0  ;;  %v1095_v5 = vld [vmem:[#allocation5 + $0x10] sm:$0xff]   ;;  %v1096_v6 = vld [vmem:[#allocation5 + $0x18] sm:$0xff]   ;;  %v1097_v7 = vld [vmem:[#allocation5 + $0x20] sm:$0xff]   ;;  %v54_v18 = vshrl.u32 %v53_v17, 7  ;;  %s823_s5 = sshll.u32 %s1219_s30, 4  ;;  %s824_s5 = int_to_ptr.vmem [resolvable:$true] %s823_s5 }
  0x29   :  { %959 = vmatpush3.bf16.msra.mxu0 %v1091_v1  ;;  %965 = vmatpush3.bf16.msra.mxu1 %v1093_v3  ;;  %v1098_v8 = vld [vmem:[#allocation5 + $0x28] sm:$0xff]   ;;  %v1099_v9 = vld [vmem:[#allocation5 + $0x30] sm:$0xff]   ;;  %v1100_v10 = vld [vmem:[#allocation5 + $0x38] sm:$0xff]   ;;  %s1185_s6 = scalar_lea.vmem %s824_s5, 128  ;;  %p1190_p3 = scmp.lt.s32.totalorder %s824_s5, %s824_s5 }
  0x2a   :  { %984 = vmatprep.subr.bf16.mxu0 %v1217_v0  ;;  %966 = vmatprep.subr.bf16.mxu1 %v1217_v0  ;;  %v1101_v11 = vld [vmem:[#allocation5 + $0x40] sm:$0xff]   ;;  %v1102_v12 = vld [vmem:[#allocation5 + $0x48] sm:$0xff]   ;;  %v1103_v13 = vld [vmem:[#allocation5 + $0x50] sm:$0xff]   ;;  %v1304_v21 = vsub.s32 0, %v54_v18  ;;  %p1186_p2 = scmp.ne.s32.totalorder %s824_s5, %s1185_s6  ;;  %p1191_p4 = scmp.lt.s32.totalorder %s1185_s6, %s1185_s6 }
  0x2b   :  { %v1104_v14 = vld [vmem:[#allocation5 + $0x58] sm:$0xff]   ;;  %v1105_v15 = vld [vmem:[#allocation5 + $0x60] sm:$0xff]   ;;  %v1106_v16 = vld [vmem:[#allocation5 + $0x68] sm:$0xff]  }
  0x2c   :  { %961 = vmatmul.mubr.msk.bf16.vlgmr.msra.gmra.mrb[0].mxu0 %vm68_vm1, %v1092_v2  ;;  %v51_v19 = vld [vmem:[%s1389_s3] sm:$0x1]  ;;  %v1107_v32 = vld [vmem:[#allocation5 + $0x70] sm:$0xff]   ;;  %v1109_v34 = vld [vmem:[#allocation5 + $0x80] sm:$0xff]   ;;  %p1192_p5 = por %p1191_p4, %p1190_p3 }
  0x2d   :  { %1000 = vmatprep.mubr.msk.bf16.mxu0 %vm1218_vm0, %v1217_v0  ;;  %967 = vmatpush3.bf16.msra.mxu1 %v1094_v4  ;;  %v52_v20 = vunpack.c.l.bf16 %v51_v19  ;;  %v1108_v33 = vld [vmem:[#allocation5 + $0x78] sm:$0xff]   ;;  %v1110_v35 = vld [vmem:[#allocation5 + $0x88] sm:$0xff]   ;;  %v1111_v36 = vld [vmem:[#allocation5 + $0x90] sm:$0xff]  }
  0x2e   :  { %968 = vmatprep.subr.bf16.mxu1 %v1217_v0  ;;  %985 = vmatpush3.bf16.msra.mxu0 %v1101_v11  ;;  %v1112_v37 = vld [vmem:[#allocation5 + $0x98] sm:$0xff]   ;;  %v1113_v38 = vld [vmem:[#allocation5 + $0xa0] sm:$0xff]   ;;  %v1114_v39 = vld [vmem:[#allocation5 + $0xa8] sm:$0xff]   ;;  %p1193_p6 = pnand %p1192_p5, %p1186_p2 }
  0x2f   :  { %986 = vmatprep.subr.bf16.mxu0 %v1217_v0  ;;  %v56_v22 = vrot.slane %v52_v20, %v1304_v21  ;;  %v839_v40 = vld [vmem:[%s1389_s3 + $0x1] sm:$0x1]  ;;  %v1115_v52 = vld [vmem:[#allocation5 + $0xb0] sm:$0xff]   ;;  %v1117_v54 = vld [vmem:[#allocation5 + $0xc0] sm:$0xff]  }
  0x30   :  { %v134_v41 = vunpack.c.l.bf16 %v839_v40  ;;  %v1116_v53 = vld [vmem:[#allocation5 + $0xb8] sm:$0xff]   ;;  %v1118_v55 = vld [vmem:[#allocation5 + $0xc8] sm:$0xff]   ;;  %v1119_v56 = vld [vmem:[#allocation5 + $0xd0] sm:$0xff]  }
  0x31   :  { %969 = vmatpush3.bf16.msra.mxu1 %v1095_v5  ;;  %v1120_v57 = vld [vmem:[#allocation5 + $0xd8] sm:$0xff]   ;;  %v1121_v58 = vld [vmem:[#allocation5 + $0xe0] sm:$0xff]   ;;  %v1122_v59 = vld [vmem:[#allocation5 + $0xe8] sm:$0xff]  }
  0x32   :  { %970 = vmatprep.subr.bf16.mxu1 %v1217_v0  ;;  %987 = vmatpush3.bf16.msra.mxu0 %v1102_v12  ;;  %v138_v42 = vrot.slane %v134_v41, %v1304_v21  ;;  %v848_v60 = vld [vmem:[%s1389_s3 + $0x2] sm:$0x1]  ;;  %v1125_v11 = vld [vmem:[#allocation5 + $0x100] sm:$0xff]   ;;  %v1126_v12 = vld [vmem:[#allocation5 + $0x108] sm:$0xff]  }
  0x33   :  { %988 = vmatprep.subr.bf16.mxu0 %v1217_v0  ;;  %v250_v61 = vunpack.c.l.bf16 %v848_v60  ;;  %v857_v17 = vld [vmem:[%s1389_s3 + $0x3] sm:$0x1] }
  0x34   :  { %v366_v18 = vunpack.c.l.bf16 %v857_v17 }
  0x35   :  { %971 = vmatpush3.bf16.msra.mxu1 %v1096_v6  ;;  %v254_v62 = vrot.slane %v250_v61, %v1304_v21 }
  0x36   :  { %972 = vmatprep.subr.bf16.mxu1 %v1217_v0  ;;  %989 = vmatpush3.bf16.msra.mxu0 %v1103_v13  ;;  %v1127_v13 = vld [vmem:[#allocation5 + $0x110] sm:$0xff]   ;;  %v370_v19 = vrot.slane %v366_v18, %v1304_v21 }
  0x37   :  { %990 = vmatprep.subr.bf16.mxu0 %v1217_v0 }
  0x39   :  { %973 = vmatpush3.bf16.msra.mxu1 %v1097_v7 }
  0x3a   :  { %974 = vmatprep.subr.bf16.mxu1 %v1217_v0  ;;  %991 = vmatpush3.bf16.msra.mxu0 %v1104_v14  ;;  %v1128_v14 = vld [vmem:[#allocation5 + $0x118] sm:$0xff]  }
  0x3b   :  { %992 = vmatprep.subr.bf16.mxu0 %v1217_v0 }
  0x3d   :  { %975 = vmatpush3.bf16.msra.mxu1 %v1098_v8 }
  0x3e   :  { %976 = vmatprep.subr.bf16.mxu1 %v1217_v0  ;;  %993 = vmatpush3.bf16.msra.mxu0 %v1105_v15  ;;  %v1129_v15 = vld [vmem:[#allocation5 + $0x120] sm:$0xff]  }
  0x3f   :  { %994 = vmatprep.subr.bf16.mxu0 %v1217_v0 }
  0x41   :  { %977 = vmatpush3.bf16.msra.mxu1 %v1099_v9  ;;  %v1123_v9 = vld [vmem:[#allocation5 + $0xf0] sm:$0xff]  }
  0x42   :  { %978 = vmatprep.subr.bf16.mxu1 %v1217_v0  ;;  %995 = vmatpush3.bf16.msra.mxu0 %v1106_v16  ;;  %v1130_v16 = vld [vmem:[#allocation5 + $0x128] sm:$0xff]  }
  0x43   :  { %996 = vmatprep.subr.bf16.mxu0 %v1217_v0 }
  0x45   :  { %979 = vmatpush3.bf16.msra.mxu1 %v1100_v10  ;;  %v1124_v10 = vld [vmem:[#allocation5 + $0xf8] sm:$0xff]  }
  0x46   :  { %1004 = vmatprep.subr.bf16.mxu1 %v1217_v0  ;;  %997 = vmatpush3.bf16.msra.mxu0 %v1107_v32  ;;  %v1133_v32 = vld [vmem:[#allocation5 + $0x140] sm:$0xff]  }
  0x47   :  { %998 = vmatprep.subr.bf16.mxu0 %v1217_v0 }
  0x4a   :  { %999 = vmatpush3.bf16.msra.mxu0 %v1108_v33  ;;  %v1134_v33 = vld [vmem:[#allocation5 + $0x148] sm:$0xff]  }
  0x4b   :  { %1024 = vmatprep.subr.bf16.mxu0 %v1217_v0 }
  0xff   :  { %v106_v23 = vpop.f32.mrb[0].mxu0 }
 0x100   :  { %v107_v24 = vadd.f32 %v106_v23, %v56_v22  ;;  %v962_v25 = vpop.f32.mrb[1].mxu0 }
 0x101   :  { %v109_v26 = vpop.f32.mrb[2].mxu0 }
 0x102   :  { %v110_v27 = vadd.f32 %v109_v26, %v56_v22  ;;  %v963_v28 = vpop.f32.mrb[3].mxu0  ;;  %v113_v29 = vmax.f32 %v107_v24, 0.0 }
 0x104   :  { %v114_v30 = vmax.f32 %v110_v27, 0.0 }
 0x106   :  { %v115_v31 = vpack.c.bf16 %v114_v30, %v113_v29  ;;  %v1131_v30 = vld [vmem:[#allocation5 + $0x130] sm:$0xff]  }
 0x108   :  { %981 = vmatmul.mubr.bf16.vlgmr.msra.gmra.mrb[0].mxu1 %v115_v31  ;;  %v1132_v31 = vld [vmem:[#allocation5 + $0x138] sm:$0xff]  }
 0x109   :  { %1020 = vmatprep.mubr.msk.bf16.mxu1 %vm1218_vm0, %v1217_v0  ;;  %1005 = vmatpush3.bf16.msra.mxu1 %v1109_v34  ;;  %v1135_v34 = vld [vmem:[#allocation5 + $0x150] sm:$0xff]  }
 0x10a   :  { %1006 = vmatprep.subr.bf16.mxu1 %v1217_v0 }
 0x10d   :  { %1007 = vmatpush3.bf16.msra.mxu1 %v1110_v35  ;;  %v1136_v35 = vld [vmem:[#allocation5 + $0x158] sm:$0xff]  }
 0x10e   :  { %1008 = vmatprep.subr.bf16.mxu1 %v1217_v0 }
 0x111   :  { %1009 = vmatpush3.bf16.msra.mxu1 %v1111_v36  ;;  %v1137_v36 = vld [vmem:[#allocation5 + $0x160] sm:$0xff]  }
 0x112   :  { %1010 = vmatprep.subr.bf16.mxu1 %v1217_v0 }
 0x115   :  { %1011 = vmatpush3.bf16.msra.mxu1 %v1112_v37  ;;  %v1138_v37 = vld [vmem:[#allocation5 + $0x168] sm:$0xff]  }
 0x116   :  { %1012 = vmatprep.subr.bf16.mxu1 %v1217_v0 }
 0x119   :  { %1013 = vmatpush3.bf16.msra.mxu1 %v1113_v38  ;;  %v866_v38 = vld [vmem:[%s1389_s3 + $0x4] sm:$0x1] }
 0x11a   :  { %1014 = vmatprep.subr.bf16.mxu1 %v1217_v0 }
 0x11d   :  { %1015 = vmatpush3.bf16.msra.mxu1 %v1114_v39  ;;  %v482_v39 = vunpack.c.l.bf16 %v866_v38 }
 0x11e   :  { %1016 = vmatprep.subr.bf16.mxu1 %v1217_v0 }
 0x11f   :  { %v486_v40 = vrot.slane %v482_v39, %v1304_v21 }
 0x121   :  { %1017 = vmatpush3.bf16.msra.mxu1 %v1115_v52  ;;  %v875_v52 = vld [vmem:[%s1389_s3 + $0x5] sm:$0x1] }
 0x122   :  { %1018 = vmatprep.subr.bf16.mxu1 %v1217_v0 }
 0x125   :  { %1019 = vmatpush3.bf16.msra.mxu1 %v1116_v53  ;;  %v598_v53 = vunpack.c.l.bf16 %v875_v52 }
 0x126   :  { %1044 = vmatprep.subr.bf16.mxu1 %v1217_v0 }
 0x1db   :  { %v221_v43 = vpop.f32.mrb[0].mxu1 }
 0x1dc   :  { %v222_v44 = vadd.f32 %v221_v43, %v138_v42  ;;  %v982_v45 = vpop.f32.mrb[1].mxu1 }
 0x1dd   :  { %v224_v46 = vpop.f32.mrb[2].mxu1 }
 0x1de   :  { %v225_v47 = vadd.f32 %v224_v46, %v138_v42  ;;  %v983_v48 = vpop.f32.mrb[3].mxu1  ;;  %v228_v49 = vmax.f32 %v222_v44, 0.0 }
 0x1e0   :  { %v229_v50 = vmax.f32 %v225_v47, 0.0 }
 0x1e2   :  { %v230_v51 = vpack.c.bf16 %v229_v50, %v228_v49  ;;  %v1139_v50 = vld [vmem:[#allocation5 + $0x170] sm:$0xff]  }
 0x1e4   :  { %1001 = vmatmul.mubr.bf16.vlgmr.msra.gmra.mrb[4].mxu0 %v230_v51  ;;  %v1140_v51 = vld [vmem:[#allocation5 + $0x178] sm:$0xff]  }
 0x1e5   :  { %1040 = vmatprep.mubr.msk.bf16.mxu0 %vm1218_vm0, %v1217_v0  ;;  %1025 = vmatpush3.bf16.msra.mxu0 %v1117_v54  ;;  %v602_v54 = vrot.slane %v598_v53, %v1304_v21 }
 0x1e6   :  { %1026 = vmatprep.subr.bf16.mxu0 %v1217_v0 }
 0x1e9   :  { %1027 = vmatpush3.bf16.msra.mxu0 %v1118_v55 }
 0x1ea   :  { %1028 = vmatprep.subr.bf16.mxu0 %v1217_v0 }
 0x1ed   :  { %1029 = vmatpush3.bf16.msra.mxu0 %v1119_v56 }
 0x1ee   :  { %1030 = vmatprep.subr.bf16.mxu0 %v1217_v0 }
 0x1f1   :  { %1031 = vmatpush3.bf16.msra.mxu0 %v1120_v57 }
 0x1f2   :  { %1032 = vmatprep.subr.bf16.mxu0 %v1217_v0 }
 0x1f5   :  { %1033 = vmatpush3.bf16.msra.mxu0 %v1121_v58 }
 0x1f6   :  { %1034 = vmatprep.subr.bf16.mxu0 %v1217_v0 }
 0x1f9   :  { %1035 = vmatpush3.bf16.msra.mxu0 %v1122_v59 }
 0x1fa   :  { %1036 = vmatprep.subr.bf16.mxu0 %v1217_v0 }
 0x1fd   :  { %1037 = vmatpush3.bf16.msra.mxu0 %v1123_v9 }
 0x1fe   :  { %1038 = vmatprep.subr.bf16.mxu0 %v1217_v0 }
 0x201   :  { %1039 = vmatpush3.bf16.msra.mxu0 %v1124_v10 }
 0x202   :  { %1064 = vmatprep.subr.bf16.mxu0 %v1217_v0 }
 0x2b7   :  { %v337_v63 = vpop.f32.mrb[4].mxu0 }
 0x2b8   :  { %v338_v1 = vadd.f32 %v337_v63, %v254_v62  ;;  %v1002_v2 = vpop.f32.mrb[5].mxu0 }
 0x2b9   :  { %v340_v3 = vpop.f32.mrb[6].mxu0 }
 0x2ba   :  { %v341_v4 = vadd.f32 %v340_v3, %v254_v62  ;;  %v1003_v5 = vpop.f32.mrb[7].mxu0  ;;  %v344_v6 = vmax.f32 %v338_v1, 0.0 }
 0x2bc   :  { %v345_v7 = vmax.f32 %v341_v4, 0.0 }
 0x2be   :  { %v346_v8 = vpack.c.bf16 %v345_v7, %v344_v6 }
 0x2c0   :  { %1021 = vmatmul.mubr.bf16.vlgmr.msra.gmra.mrb[4].mxu1 %v346_v8 }
 0x2c1   :  { %1060 = vmatprep.mubr.msk.bf16.mxu1 %vm1218_vm0, %v1217_v0  ;;  %1045 = vmatpush3.bf16.msra.mxu1 %v1125_v11 }
 0x2c2   :  { %1046 = vmatprep.subr.bf16.mxu1 %v1217_v0 }
 0x2c5   :  { %1047 = vmatpush3.bf16.msra.mxu1 %v1126_v12 }
 0x2c6   :  { %1048 = vmatprep.subr.bf16.mxu1 %v1217_v0 }
 0x2c9   :  { %1049 = vmatpush3.bf16.msra.mxu1 %v1127_v13 }
 0x2ca   :  { %1050 = vmatprep.subr.bf16.mxu1 %v1217_v0 }
 0x2cd   :  { %1051 = vmatpush3.bf16.msra.mxu1 %v1128_v14 }
 0x2ce   :  { %1052 = vmatprep.subr.bf16.mxu1 %v1217_v0 }
 0x2d1   :  { %1053 = vmatpush3.bf16.msra.mxu1 %v1129_v15 }
 0x2d2   :  { %1054 = vmatprep.subr.bf16.mxu1 %v1217_v0 }
 0x2d5   :  { %1055 = vmatpush3.bf16.msra.mxu1 %v1130_v16 }
 0x2d6   :  { %1056 = vmatprep.subr.bf16.mxu1 %v1217_v0 }
 0x2d9   :  { %1057 = vmatpush3.bf16.msra.mxu1 %v1131_v30 }
 0x2da   :  { %1058 = vmatprep.subr.bf16.mxu1 %v1217_v0 }
 0x2dd   :  { %1059 = vmatpush3.bf16.msra.mxu1 %v1132_v31 }
 0x393   :  { %v453_v20 = vpop.f32.mrb[4].mxu1 }
 0x394   :  { %v454_v22 = vadd.f32 %v453_v20, %v370_v19  ;;  %v1022_v23 = vpop.f32.mrb[5].mxu1 }
 0x395   :  { %v456_v24 = vpop.f32.mrb[6].mxu1 }
 0x396   :  { %v457_v25 = vadd.f32 %v456_v24, %v370_v19  ;;  %v1023_v26 = vpop.f32.mrb[7].mxu1  ;;  %v460_v27 = vmax.f32 %v454_v22, 0.0 }
 0x398   :  { %v461_v28 = vmax.f32 %v457_v25, 0.0 }
 0x39a   :  { %v462_v29 = vpack.c.bf16 %v461_v28, %v460_v27 }
 0x39c   :  { %1041 = vmatmul.mubr.bf16.vlgmr.msra.gmra.mrb[8].mxu0 %v462_v29 }
 0x39d   :  { %1080 = vmatprep.mubr.msk.bf16.mxu0 %vm1218_vm0, %v1217_v0  ;;  %1065 = vmatpush3.bf16.msra.mxu0 %v1133_v32 }
 0x39e   :  { %1066 = vmatprep.subr.bf16.mxu0 %v1217_v0 }
 0x3a1   :  { %1067 = vmatpush3.bf16.msra.mxu0 %v1134_v33 }
 0x3a2   :  { %1068 = vmatprep.subr.bf16.mxu0 %v1217_v0 }
 0x3a5   :  { %1069 = vmatpush3.bf16.msra.mxu0 %v1135_v34 }
 0x3a6   :  { %1070 = vmatprep.subr.bf16.mxu0 %v1217_v0 }
 0x3a9   :  { %1071 = vmatpush3.bf16.msra.mxu0 %v1136_v35 }
 0x3aa   :  { %1072 = vmatprep.subr.bf16.mxu0 %v1217_v0 }
 0x3ad   :  { %1073 = vmatpush3.bf16.msra.mxu0 %v1137_v36 }
 0x3ae   :  { %1074 = vmatprep.subr.bf16.mxu0 %v1217_v0 }
 0x3b1   :  { %1075 = vmatpush3.bf16.msra.mxu0 %v1138_v37 }
 0x3b2   :  { %1076 = vmatprep.subr.bf16.mxu0 %v1217_v0 }
 0x3b5   :  { %1077 = vmatpush3.bf16.msra.mxu0 %v1139_v50 }
 0x3b6   :  { %1078 = vmatprep.subr.bf16.mxu0 %v1217_v0  ;;  %v884_v0 = vld [vmem:[%s1389_s3 + $0x6] sm:$0x1] }
 0x3b7   :  { %v714_v1 = vunpack.c.l.bf16 %v884_v0 }
 0x3b9   :  { %1079 = vmatpush3.bf16.msra.mxu0 %v1140_v51  ;;  %v718_v2 = vrot.slane %v714_v1, %v1304_v21 }
 0x46f   :  { %v569_v41 = vpop.f32.mrb[8].mxu0 }
 0x470   :  { %v570_v42 = vadd.f32 %v569_v41, %v486_v40  ;;  %v1042_v43 = vpop.f32.mrb[9].mxu0 }
 0x471   :  { %v572_v44 = vpop.f32.mrb[10].mxu0 }
 0x472   :  { %v573_v45 = vadd.f32 %v572_v44, %v486_v40  ;;  %v1043_v46 = vpop.f32.mrb[11].mxu0  ;;  %v576_v47 = vmax.f32 %v570_v42, 0.0 }
 0x474   :  { %v577_v48 = vmax.f32 %v573_v45, 0.0 }
 0x476   :  { %v578_v49 = vpack.c.bf16 %v577_v48, %v576_v47 }
 0x478   :  { %1061 = vmatmul.mubr.bf16.vlgmr.msra.gmra.mrb[8].mxu1 %v578_v49 }
 0x54b   :  { %v685_v55 = vpop.f32.mrb[8].mxu1 }
 0x54c   :  { %v686_v56 = vadd.f32 %v685_v55, %v602_v54  ;;  %v1062_v57 = vpop.f32.mrb[9].mxu1 }
 0x54d   :  { %v688_v58 = vpop.f32.mrb[10].mxu1 }
 0x54e   :  { %v689_v59 = vadd.f32 %v688_v58, %v602_v54  ;;  %v1063_v60 = vpop.f32.mrb[11].mxu1  ;;  %v692_v61 = vmax.f32 %v686_v56, 0.0 }
 0x550   :  { %v693_v62 = vmax.f32 %v689_v59, 0.0 }
 0x552   :  { %v694_v63 = vpack.c.bf16 %v693_v62, %v692_v61 }
 0x554   :  { %1081 = vmatmul.mubr.bf16.vlgmr.msra.gmra.mrb[12].mxu0 %v694_v63 }
 0x627   :  { %v801_v3 = vpop.f32.mrb[12].mxu0 }
 0x628   :  { %v1082_v4 = vpop.f32.mrb[13].mxu0  ;;  %v802_v6 = vadd.f32 %v801_v3, %v718_v2 }
 0x629   :  { %v804_v5 = vpop.f32.mrb[14].mxu0 }
 0x62a   :  { %v805_v7 = vadd.f32 %v804_v5, %v718_v2  ;;  %v1083_v8 = vpop.f32.mrb[15].mxu0 }
 0x62c   :  { %v900_v9 = vpack.c.bf16 %v805_v7, %v802_v6 }
 0x62e   :  { %901 = vst [vmem:[#allocation7] sm:$0xff] %v900_v9  }
 0x62f   :  { %1196 = shalt.err (!%p1193_p6)
}
 0x630   :  { %s1197_s8 = scalar_lea.hbm %s1390_s4, 128 }
 0x631   :  { %p1198_p7 = scmp.ne.s32.totalorder %s1390_s4, %s1197_s8  ;;  %p1201_p8 = scmp.lt.u32.totalorder %s1197_s8, %s1390_s4 }
 0x633   :  { %p1203_p9 = pnand %p1201_p8, %p1198_p7 }
 0x635   :  { %1206 = shalt.err (!%p1203_p9)
}
 0x636   :  { %829 = dma.vmem_to_hbm [thread:$0]  %s824_s5, 128, %s1390_s4, [#allocation4], %s1214_s25, %s1214_s25, %s1215_s26  }
 0x637   :  { %1211 = dma.done.wait [#allocation4], 128  }
 0x638   :  { %1212 = vsyncadd [#allocation4], 4294967168 }
 0x639   :  { %833 = vsyncpa [#allocation3], 1 }
 0x63a   :  { %834 = vsyncpa [#allocation6], 1 }
 0x63b   :  { %835 = vsyncpa [#allocation4], 1 }

</bundles_post_ra>
